<compile_context>
chip_gen: v7x
topology: tpu7x:2x2x1
jax: 0.10.0
libtpu: 0.0.40
codegen_flags: <defaults>
</compile_context>

<pallas_src>
import jax
import jax.numpy as jnp
from jax.experimental import pallas as pl
from jax.experimental.pallas import tpu as pltpu


def _round_up(n, m):
    return ((n + m - 1) // m) * m


def ik_nn_kernel(x_ref, w1_ref, b1_ref, wh_ref, bh_ref, wo_ref, bo_ref, o_ref):
    # x_ref: (TB, F_pad); w1: (F_pad, H); wh: (3, H, H); wo: (H, O_pad)
    h = jnp.tanh(
        jnp.dot(x_ref[...], w1_ref[...], preferred_element_type=jnp.float32)
        + b1_ref[...])
    # Static unroll over the 3 stacked identical hidden layers (l2, l3, l4).
    for l in range(3):
        h = jnp.tanh(
            jnp.dot(h, wh_ref[l], preferred_element_type=jnp.float32)
            + bh_ref[l])
    y = (jnp.dot(h, wo_ref[...], preferred_element_type=jnp.float32)
         + bo_ref[...])
    o_ref[...] = y.astype(o_ref.dtype)


def init_params(key, n_feature, n_neuron, n_output):
    """Deterministic init mimicking torch.nn.Linear default U(-1/sqrt(fan_in), .).
    Weights stored as [in_dim, out_dim] (transposed vs PyTorch) so the kernel
    computes y = x @ W + b directly on the MXU."""
    dims = [(n_feature, n_neuron), (n_neuron, n_neuron), (n_neuron, n_neuron),
            (n_neuron, n_neuron), (n_neuron, n_output)]
    names = ["1", "2", "3", "4", "o"]
    params = {}
    for (fan_in, fan_out), name in zip(dims, names):
        key, kw, kb = jax.random.split(key, 3)
        bound = 1.0 / jnp.sqrt(fan_in)
        params["w" + name] = jax.random.uniform(
            kw, (fan_in, fan_out), jnp.float32, minval=-bound, maxval=bound)
        params["b" + name] = jax.random.uniform(
            kb, (1, fan_out), jnp.float32, minval=-bound, maxval=bound)
    return params


def pack_params(params):
    """Zero-pad all dims to lane width (128) and stack the 3 hidden layers."""
    LANE = 128
    n_feature = params["w1"].shape[0]
    n_neuron = params["w1"].shape[1]
    n_output = params["wo"].shape[1]
    F_pad = _round_up(n_feature, LANE)
    H_pad = _round_up(n_neuron, LANE)
    O_pad = _round_up(n_output, LANE)

    def pad2(w, rows, cols):
        out = jnp.zeros((rows, cols), jnp.float32)
        return out.at[:w.shape[0], :w.shape[1]].set(w)

    packed = {
        "w1": pad2(params["w1"], F_pad, H_pad),
        "b1": pad2(params["b1"], 1, H_pad),
        "wh": jnp.stack([pad2(params[k], H_pad, H_pad)
                         for k in ("w2", "w3", "w4")]),
        "bh": jnp.stack([pad2(params[k], 1, H_pad)
                         for k in ("b2", "b3", "b4")]),
        "wo": pad2(params["wo"], H_pad, O_pad),
        "bo": pad2(params["bo"], 1, O_pad),
    }
    meta = dict(n_feature=n_feature, n_output=n_output,
                F_pad=F_pad, H_pad=H_pad, O_pad=O_pad)
    return packed, meta


def ik_nn_forward(x, packed, meta, *, block_batch=1024):
    """x: [B, n_feature] f32. Returns [B, n_output] f32."""
    B, n_feature = x.shape
    F_pad, H_pad, O_pad = meta["F_pad"], meta["H_pad"], meta["O_pad"]
    n_output = meta["n_output"]

    # Batch tile: at most block_batch rows, at least sublane-aligned (8).
    tb = min(block_batch, _round_up(B, 8))
    B_pad = _round_up(B, tb)

    # Zero-pad batch rows and feature lanes (inert: sliced off / zero weights).
    x_pad = jnp.zeros((B_pad, F_pad), jnp.float32).at[:B, :n_feature].set(x)

    grid = (pl.cdiv(B_pad, tb),)
    out = pl.pallas_call(
        ik_nn_kernel,
        out_shape=jax.ShapeDtypeStruct((B_pad, O_pad), jnp.float32),
        grid=grid,
        in_specs=[
            pl.BlockSpec((tb, F_pad), lambda i: (i, 0)),        # x: batch-tiled
            pl.BlockSpec((F_pad, H_pad), lambda i: (0, 0)),     # w1: resident
            pl.BlockSpec((1, H_pad), lambda i: (0, 0)),         # b1: resident
            pl.BlockSpec((3, H_pad, H_pad), lambda i: (0, 0, 0)),  # w2..w4
            pl.BlockSpec((3, 1, H_pad), lambda i: (0, 0, 0)),      # b2..b4
            pl.BlockSpec((H_pad, O_pad), lambda i: (0, 0)),     # wo: resident
            pl.BlockSpec((1, O_pad), lambda i: (0, 0)),         # bo: resident
        ],
        out_specs=pl.BlockSpec((tb, O_pad), lambda i: (i, 0)),
        compiler_params=pltpu.CompilerParams(
            dimension_semantics=("parallel",)),
    )(x_pad, packed["w1"], packed["b1"], packed["wh"], packed["bh"],
      packed["wo"], packed["bo"])

    return out[:B, :n_output]


def ik_nn_reference(x, params):
    """Pure-JAX reference (unpadded) for correctness check."""
    h = jnp.tanh(x @ params["w1"] + params["b1"])
    h = jnp.tanh(h @ params["w2"] + params["b2"])
    h = jnp.tanh(h @ params["w3"] + params["b3"])
    h = jnp.tanh(h @ params["w4"] + params["b4"])
    return h @ params["wo"] + params["bo"]


if __name__ == "__main__":
    # IK net: 8 pose features -> 32 hidden neurons -> 4 joint outputs.
    # B=256 with block_batch=128 exercises the batch grid (2 steps).
    B, n_feature, n_neuron, n_output = 256, 8, 32, 4

    key = jax.random.PRNGKey(0)
    key, kx = jax.random.split(key)
    x = jax.random.normal(kx, (B, n_feature), jnp.float32)
    params = init_params(key, n_feature, n_neuron, n_output)

    packed, meta = pack_params(params)
    out = ik_nn_forward(x, packed, meta, block_batch=128)
    out = jax.block_until_ready(out)

    ref = ik_nn_reference(x, params)
    assert out.shape == (B, n_output)
    assert jnp.allclose(out, ref, atol=1e-5, rtol=1e-5)

    # Also check a batch that is not a multiple of the tile size.
    out_small = jax.block_until_ready(
        ik_nn_forward(x[:13], packed, meta, block_batch=128))
    assert jnp.allclose(out_small, ref[:13], atol=1e-5, rtol=1e-5)

    print("KERNEL_OK")
</pallas_src>

<mosaic_0001>
module attributes {stable_mosaic.version = 11 : i64} {
  func.func @ik_nn_kernel(%arg0: i32, %arg1: memref<128x128xf32, #tpu.memory_space<vmem>>, %arg2: memref<128x128xf32, #tpu.memory_space<vmem>>, %arg3: memref<1x128xf32, #tpu.memory_space<vmem>>, %arg4: memref<3x128x128xf32, #tpu.memory_space<vmem>>, %arg5: memref<3x1x128xf32, #tpu.memory_space<vmem>>, %arg6: memref<128x128xf32, #tpu.memory_space<vmem>>, %arg7: memref<1x128xf32, #tpu.memory_space<vmem>>, %arg8: memref<128x128xf32, #tpu.memory_space<vmem>>) attributes {dimension_semantics = [#tpu.dimension_semantics<parallel>], iteration_bounds = array<i64: 2>, scalar_prefetch = 0 : i64, scratch_operands = 0 : i64, tpu.core_type = #tpu.core_type<tc>, window_params = [{transform_indices = @transform_0, window_bounds = array<i64: 128, 128>}, {pipeline_mode = #tpu.pipeline_mode<synchronous>, transform_indices = @transform_1, window_bounds = array<i64: 128, 128>}, {pipeline_mode = #tpu.pipeline_mode<synchronous>, transform_indices = @transform_2, window_bounds = array<i64: 1, 128>}, {pipeline_mode = #tpu.pipeline_mode<synchronous>, transform_indices = @transform_3, window_bounds = array<i64: 3, 128, 128>}, {pipeline_mode = #tpu.pipeline_mode<synchronous>, transform_indices = @transform_4, window_bounds = array<i64: 3, 1, 128>}, {pipeline_mode = #tpu.pipeline_mode<synchronous>, transform_indices = @transform_5, window_bounds = array<i64: 128, 128>}, {pipeline_mode = #tpu.pipeline_mode<synchronous>, transform_indices = @transform_6, window_bounds = array<i64: 1, 128>}, {transform_indices = @transform_7, window_bounds = array<i64: 128, 128>}]} {
    %c0 = arith.constant 0 : index
    %c0_0 = arith.constant 0 : index
    %0 = vector.load %arg1[%c0, %c0_0] : memref<128x128xf32, #tpu.memory_space<vmem>>, vector<128x128xf32>
    %c0_1 = arith.constant 0 : index
    %c0_2 = arith.constant 0 : index
    %1 = vector.load %arg2[%c0_1, %c0_2] : memref<128x128xf32, #tpu.memory_space<vmem>>, vector<128x128xf32>
    %cst = arith.constant dense<0.000000e+00> : vector<128x128xf32>
    %2 = tpu.matmul %0, %1, %cst {dimension_numbers = #tpu.dot_dimension_numbers<[1], [0], [0], [1], [0, 0, 1, 1], [], []>} : vector<128x128xf32>, vector<128x128xf32>, vector<128x128xf32> -> vector<128x128xf32>
    %c0_3 = arith.constant 0 : index
    %c0_4 = arith.constant 0 : index
    %3 = vector.load %arg3[%c0_3, %c0_4] : memref<1x128xf32, #tpu.memory_space<vmem>>, vector<1x128xf32>
    %4 = vector.broadcast %3 : vector<1x128xf32> to vector<128x128xf32>
    %5 = arith.addf %2, %4 : vector<128x128xf32>
    %6 = math.tanh %5 : vector<128x128xf32>
    %c0_5 = arith.constant 0 : index
    %c0_6 = arith.constant 0 : index
    %c0_7 = arith.constant 0 : index
    %7 = vector.load %arg4[%c0_5, %c0_6, %c0_7] : memref<3x128x128xf32, #tpu.memory_space<vmem>>, vector<1x128x128xf32>
    %8 = vector.shape_cast %7 : vector<1x128x128xf32> to vector<128x128xf32>
    %cst_8 = arith.constant dense<0.000000e+00> : vector<128x128xf32>
    %9 = tpu.matmul %6, %8, %cst_8 {dimension_numbers = #tpu.dot_dimension_numbers<[1], [0], [0], [1], [0, 0, 1, 1], [], []>} : vector<128x128xf32>, vector<128x128xf32>, vector<128x128xf32> -> vector<128x128xf32>
    %c0_9 = arith.constant 0 : index
    %c0_10 = arith.constant 0 : index
    %c0_11 = arith.constant 0 : index
    %10 = vector.load %arg5[%c0_9, %c0_10, %c0_11] : memref<3x1x128xf32, #tpu.memory_space<vmem>>, vector<1x1x128xf32>
    %11 = vector.shape_cast %10 : vector<1x1x128xf32> to vector<1x128xf32>
    %12 = vector.broadcast %11 : vector<1x128xf32> to vector<128x128xf32>
    %13 = arith.addf %9, %12 : vector<128x128xf32>
    %14 = math.tanh %13 : vector<128x128xf32>
    %c1 = arith.constant 1 : index
    %c0_12 = arith.constant 0 : index
    %c0_13 = arith.constant 0 : index
    %15 = vector.load %arg4[%c1, %c0_12, %c0_13] : memref<3x128x128xf32, #tpu.memory_space<vmem>>, vector<1x128x128xf32>
    %16 = vector.shape_cast %15 : vector<1x128x128xf32> to vector<128x128xf32>
    %cst_14 = arith.constant dense<0.000000e+00> : vector<128x128xf32>
    %17 = tpu.matmul %14, %16, %cst_14 {dimension_numbers = #tpu.dot_dimension_numbers<[1], [0], [0], [1], [0, 0, 1, 1], [], []>} : vector<128x128xf32>, vector<128x128xf32>, vector<128x128xf32> -> vector<128x128xf32>
    %c1_15 = arith.constant 1 : index
    %c0_16 = arith.constant 0 : index
    %c0_17 = arith.constant 0 : index
    %18 = vector.load %arg5[%c1_15, %c0_16, %c0_17] : memref<3x1x128xf32, #tpu.memory_space<vmem>>, vector<1x1x128xf32>
    %19 = vector.shape_cast %18 : vector<1x1x128xf32> to vector<1x128xf32>
    %20 = vector.broadcast %19 : vector<1x128xf32> to vector<128x128xf32>
    %21 = arith.addf %17, %20 : vector<128x128xf32>
    %22 = math.tanh %21 : vector<128x128xf32>
    %c2 = arith.constant 2 : index
    %c0_18 = arith.constant 0 : index
    %c0_19 = arith.constant 0 : index
    %23 = vector.load %arg4[%c2, %c0_18, %c0_19] : memref<3x128x128xf32, #tpu.memory_space<vmem>>, vector<1x128x128xf32>
    %24 = vector.shape_cast %23 : vector<1x128x128xf32> to vector<128x128xf32>
    %cst_20 = arith.constant dense<0.000000e+00> : vector<128x128xf32>
    %25 = tpu.matmul %22, %24, %cst_20 {dimension_numbers = #tpu.dot_dimension_numbers<[1], [0], [0], [1], [0, 0, 1, 1], [], []>} : vector<128x128xf32>, vector<128x128xf32>, vector<128x128xf32> -> vector<128x128xf32>
    %c2_21 = arith.constant 2 : index
    %c0_22 = arith.constant 0 : index
    %c0_23 = arith.constant 0 : index
    %26 = vector.load %arg5[%c2_21, %c0_22, %c0_23] : memref<3x1x128xf32, #tpu.memory_space<vmem>>, vector<1x1x128xf32>
    %27 = vector.shape_cast %26 : vector<1x1x128xf32> to vector<1x128xf32>
    %28 = vector.broadcast %27 : vector<1x128xf32> to vector<128x128xf32>
    %29 = arith.addf %25, %28 : vector<128x128xf32>
    %30 = math.tanh %29 : vector<128x128xf32>
    %c0_24 = arith.constant 0 : index
    %c0_25 = arith.constant 0 : index
    %31 = vector.load %arg6[%c0_24, %c0_25] : memref<128x128xf32, #tpu.memory_space<vmem>>, vector<128x128xf32>
    %cst_26 = arith.constant dense<0.000000e+00> : vector<128x128xf32>
    %32 = tpu.matmul %30, %31, %cst_26 {dimension_numbers = #tpu.dot_dimension_numbers<[1], [0], [0], [1], [0, 0, 1, 1], [], []>} : vector<128x128xf32>, vector<128x128xf32>, vector<128x128xf32> -> vector<128x128xf32>
    %c0_27 = arith.constant 0 : index
    %c0_28 = arith.constant 0 : index
    %33 = vector.load %arg7[%c0_27, %c0_28] : memref<1x128xf32, #tpu.memory_space<vmem>>, vector<1x128xf32>
    %34 = vector.broadcast %33 : vector<1x128xf32> to vector<128x128xf32>
    %35 = arith.addf %32, %34 : vector<128x128xf32>
    %c0_29 = arith.constant 0 : index
    %c0_30 = arith.constant 0 : index
    %36 = vector.load %arg8[%c0_29, %c0_30] : memref<128x128xf32, #tpu.memory_space<vmem>>, vector<128x128xf32>
    tpu.vector_store %arg8[%c0_29, %c0_30], %35 {strides = array<i32>} : memref<128x128xf32, #tpu.memory_space<vmem>>, vector<128x128xf32>,
    return
  }
  func.func @transform_0(%arg0: i32) -> (i32, i32) {
    %c0_i32 = arith.constant 0 : i32
    %c0_i32_0 = arith.constant 0 : i32
    return %arg0, %c0_i32 : i32, i32
  }
  func.func @transform_1(%arg0: i32) -> (i32, i32) {
    %c0_i32 = arith.constant 0 : i32
    %c0_i32_0 = arith.constant 0 : i32
    %c0_i32_1 = arith.constant 0 : i32
    return %c0_i32, %c0_i32_0 : i32, i32
  }
  func.func @transform_2(%arg0: i32) -> (i32, i32) {
    %c0_i32 = arith.constant 0 : i32
    %c0_i32_0 = arith.constant 0 : i32
    %c0_i32_1 = arith.constant 0 : i32
    return %c0_i32, %c0_i32_0 : i32, i32
  }
  func.func @transform_3(%arg0: i32) -> (i32, i32, i32) {
    %c0_i32 = arith.constant 0 : i32
    %c0_i32_0 = arith.constant 0 : i32
    %c0_i32_1 = arith.constant 0 : i32
    %c0_i32_2 = arith.constant 0 : i32
    return %c0_i32, %c0_i32_0, %c0_i32_1 : i32, i32, i32
  }
  func.func @transform_4(%arg0: i32) -> (i32, i32, i32) {
    %c0_i32 = arith.constant 0 : i32
    %c0_i32_0 = arith.constant 0 : i32
    %c0_i32_1 = arith.constant 0 : i32
    %c0_i32_2 = arith.constant 0 : i32
    return %c0_i32, %c0_i32_0, %c0_i32_1 : i32, i32, i32
  }
  func.func @transform_5(%arg0: i32) -> (i32, i32) {
    %c0_i32 = arith.constant 0 : i32
    %c0_i32_0 = arith.constant 0 : i32
    %c0_i32_1 = arith.constant 0 : i32
    return %c0_i32, %c0_i32_0 : i32, i32
  }
  func.func @transform_6(%arg0: i32) -> (i32, i32) {
    %c0_i32 = arith.constant 0 : i32
    %c0_i32_0 = arith.constant 0 : i32
    %c0_i32_1 = arith.constant 0 : i32
    return %c0_i32, %c0_i32_0 : i32, i32
  }
  func.func @transform_7(%arg0: i32) -> (i32, i32) {
    %c0_i32 = arith.constant 0 : i32
    %c0_i32_0 = arith.constant 0 : i32
    return %arg0, %c0_i32 : i32, i32
  }
}

</mosaic_0001>

<bundles_post_ra>
// kernel: tpu_custom_call.1
= control target key start
LH: loop header
LB: loop body
LE: loop exit
PB: predicated region body
PF: predicated region fallthrough
CT: control target
= control target key end

     0   :  { %12 = vsyncpa [#allocation3], 0  ;;  %s2903_s0 = inlined_call_operand.hbm [shape: f32[256,128], index: 0, kind: input, shape index: {}]   ;;  %s2904_s1 = inlined_call_operand.hbm [shape: f32[128,128], index: 1, kind: input, shape index: {}]   ;;  %s2905_s2 = inlined_call_operand.vmem [shape: f32[1,128], index: 2, kind: input, shape index: {}]   ;;  %s2906_s3 = inlined_call_operand.hbm [shape: f32[3,128,128], index: 3, kind: input, shape index: {}]   ;;  %s2907_s4 = inlined_call_operand.vmem [shape: f32[3,1,128], index: 4, kind: input, shape index: {}]   ;;  %s2908_s5 = inlined_call_operand.hbm [shape: f32[128,128], index: 5, kind: input, shape index: {}]   ;;  %s2909_s6 = inlined_call_operand.vmem [shape: f32[1,128], index: 6, kind: input, shape index: {}]   ;;  %s2910_s7 = inlined_call_operand.hbm [shape: f32[256,128], index: 7, kind: output, shape index: {}]  }
   0x1   :  { %14 = vsyncpa [#allocation3 + $0x1], 0 }
   0x2   :  { %15 = vsyncpa [#allocation6], 0 }
   0x3   :  { %16 = vsyncpa [#allocation9], 0 }
   0x4   :  { %17 = vsyncpa [#allocation4], 0 }
   0x5   :  { %19 = vsyncpa [#allocation4 + $0x1], 0  ;;  %s2492_s24 = smov 0   ;;  %s2494_s25 = smov 0  }
   0x6   :  { %s2496_s26 = smov 0   ;;  %s2498_s27 = smov 0  }
   0x7 LB: > { %s2513_s28 = sadd.s32 4294967295, %s2441_s27   ;;  %s1399_s29 = sadd.s32 4294967294, %s2441_s27   ;;  %s2441_s27 = sphi %s2498_s27, %s2936_s27   ;;  %s2437_s26 = sphi %s2496_s26, %s2935_s26   ;;  %s2433_s25 = sphi %s2494_s25, %s2934_s25   ;;  %s2429_s24 = sphi %s2492_s24, %s2933_s24  }
   0x8   : > { %p45_p0 = scmp.ne.s32.totalorder %s2433_s25, %s2429_s24  ;;  %p2911_p1 = scmp.eq.s32.totalorder %s2513_s28, 0 }
   0x9   : > { %p201_p3 = scmp.eq.s32.totalorder %s1399_s29, 1  ;;  %p1400_p5 = scmp.ge.s32.totalorder %s2441_s27, 1 }
   0xa   : > { %p2522_p4 = por %p2911_p1, %p45_p0  ;;  %p208_p7 = scmp.lt.s32.totalorder %s2441_s27, 3 }
   0xb   : > { %p2527_p6 = por %p201_p3, %p45_p0  ;;  %s2443_s10 = smov [#allocation5]  }
   0xc   : > { %s2915_s30 = scalar_select %p2522_p4, 1, 0 }
   0xd   : > { %s2916_s8 = scalar_select %p2527_p6, 1, 0 }
   0xe   : > { %p2532_p8 = pnand %p1400_p5, %p208_p7  ;;  %s220_s11 = sshll.u32 %s2443_s10, 4  ;;  %s2536_s11 = int_to_ptr.vmem [resolvable:$true] %s220_s11 }
   0xf   : > { %2917 = sst [smem:[#allocation15_spill]] %s2916_s8  ;;  %s2444_s13 = smov [#allocation7]  }
  0x10   : > { %s2918_s9 = scalar_select %p2532_p8, 1, 0 }
  0x11   : > { %p2060_p9 = pneg %p2532_p8  ;;  %s236_s14 = sshll.u32 %s2444_s13, 4  ;;  %s2547_s14 = int_to_ptr.vmem [resolvable:$true] %s236_s14 }
  0x12   : > { %s2445_s15 = smov [#allocation8]   ;;  %s2253_s19 = scalar_lea.hbm %s2904_s1, 2048 }
  0x13   : > { %p2543_p11 = pnand %p2060_p9, %p2911_p1  ;;  %s2549_s16 = sshll.u32 %s2445_s15, 4  ;;  %s253_s16 = int_to_ptr.vmem [resolvable:$true] %s2549_s16 }
  0x14   : > { %p2254_p12 = scmp.ne.s32.totalorder %s2904_s1, %s2253_s19  ;;  %p2260_p5 = scmp.lt.u32.totalorder %s2253_s19, %s2904_s1 }
  0x15   : > { %p2559_p13 = pneg %p2543_p11 }
  0x17   : > { %p2256_p0 = pnand %p2559_p13, %p2254_p12 }
  0x19   : > { %p2257_p3 = pneg %p2256_p0 }
  0x1b   : > { %p2262_p7 = pnand %p2260_p5, %p2257_p3 }
  0x1d   : > { %2265 = shalt.err (!%p2262_p7)
}
  0x1e   : > { %s2266_s10 = scalar_lea.vmem %s2536_s11, 2048  ;;  %p2274_p2 = scmp.lt.s32.totalorder %s2536_s11, %s2536_s11 }
  0x1f   : > { %p2267_p9 = scmp.ne.s32.totalorder %s2536_s11, %s2266_s10  ;;  %p2275_p6 = scmp.lt.s32.totalorder %s2266_s10, %s2266_s10 }
  0x21   : > { %p2269_p10 = pnand %p2267_p9, %p2559_p13  ;;  %p2276_p12 = por %p2275_p6, %p2274_p2 }
  0x23   : > { %p2270_p1 = pneg %p2269_p10 }
  0x25   : > { %p2277_p0 = pnand %p2276_p12, %p2270_p1 }
  0x27   : > { %2280 = shalt.err (!%p2277_p0)
}
  0x28   : > { %s2446_s13 = smov 128   ;;  %s2447_s15 = smov 8  }
  0x29   : > { %2063 = dma.hbm_to_vmem [thread:$0]  (!%p2543_p11), %s2904_s1, 2048, %s2536_s11, [#allocation6], %s2446_s13, %s2446_s13, %s2447_s15  }
  0x2a   : > { %s2281_s21 = scalar_lea.hbm %s2906_s3, 6144 }
  0x2b   : > { %p2282_p1 = scmp.ne.s32.totalorder %s2906_s3, %s2281_s21  ;;  %p2288_p10 = scmp.lt.u32.totalorder %s2281_s21, %s2906_s3 }
  0x2d   : > { %p2284_p2 = pnand %p2282_p1, %p2559_p13 }
  0x2f   : > { %p2285_p6 = pneg %p2284_p2 }
  0x31   : > { %p2290_p3 = pnand %p2288_p10, %p2285_p6 }
  0x33   : > { %2293 = shalt.err (!%p2290_p3)
}
  0x34   : > { %s2294_s11 = scalar_lea.vmem %s2547_s14, 6144  ;;  %p2302_p12 = scmp.lt.s32.totalorder %s2547_s14, %s2547_s14 }
  0x35   : > { %p2295_p5 = scmp.ne.s32.totalorder %s2547_s14, %s2294_s11  ;;  %p2303_p0 = scmp.lt.s32.totalorder %s2294_s11, %s2294_s11 }
  0x37   : > { %p2297_p7 = pnand %p2295_p5, %p2559_p13  ;;  %p2304_p1 = por %p2303_p0, %p2302_p12 }
  0x39   : > { %p2298_p9 = pneg %p2297_p7 }
  0x3b   : > { %p2305_p2 = pnand %p2304_p1, %p2298_p9 }
  0x3d   : > { %2308 = shalt.err (!%p2305_p2)
}
  0x3e   : > { %2066 = dma.hbm_to_vmem [thread:$0]  (!%p2543_p11), %s2906_s3, 6144, %s2547_s14, [#allocation6], %s2446_s13, %s2446_s13, %s2447_s15  }
  0x3f   : > { %s2309_s20 = scalar_lea.hbm %s2908_s5, 2048 }
  0x40   : > { %p2310_p6 = scmp.ne.s32.totalorder %s2908_s5, %s2309_s20  ;;  %p2316_p5 = scmp.lt.u32.totalorder %s2309_s20, %s2908_s5 }
  0x42   : > { %p2312_p10 = pnand %p2310_p6, %p2559_p13 }
  0x44   : > { %p2313_p3 = pneg %p2312_p10 }
  0x46   : > { %p2318_p7 = pnand %p2316_p5, %p2313_p3 }
  0x48   : > { %2321 = shalt.err (!%p2318_p7)
}
  0x49   : > { %s2322_s11 = scalar_lea.vmem %s253_s16, 2048  ;;  %p2330_p1 = scmp.lt.s32.totalorder %s253_s16, %s253_s16 }
  0x4a   : > { %p2323_p9 = scmp.ne.s32.totalorder %s253_s16, %s2322_s11  ;;  %p2331_p2 = scmp.lt.s32.totalorder %s2322_s11, %s2322_s11 }
  0x4c   : > { %p2325_p12 = pnand %p2323_p9, %p2559_p13  ;;  %p2332_p4 = por %p2331_p2, %p2330_p1 }
  0x4e   : > { %p2326_p0 = pneg %p2325_p12 }
  0x50   : > { %p2333_p8 = pnand %p2332_p4, %p2326_p0 }
  0x52   : > { %2336 = shalt.err (!%p2333_p8)
}
  0x53   : > { %2069 = dma.hbm_to_vmem [thread:$0]  (!%p2543_p11), %s2908_s5, 2048, %s253_s16, [#allocation9], %s2446_s13, %s2446_s13, %s2447_s15  }
  0x54   : > { %s2632_s22 = sadd.s32 1, %s2441_s27   ;;  %s32_s17 = sadd.s32 1, %s2437_s26 }
  0x55   : > { %s29_s12 = ssub.s32 %s2441_s27, %s2632_s22  ;;  %p39_p8 = scmp.ne.s32.totalorder %s2437_s26, %s2433_s25 }
  0x56   : > { %p30_p4 = scmp.eq.s32.totalorder %s29_s12, 0  ;;  %p40_p13 = scmp.eq.s32.totalorder %s2441_s27, 0 }
  0x57   : > { %p2081_p6 = scmp.lt.s32.totalorder %s2441_s27, 2  ;;  %p2921_p3 = scmp.eq.s32.totalorder %s2513_s28, 1 }
  0x58   : > { %s2642_s18 = scalar_select %p30_p4, %s2437_s26, %s32_s17  }
  0x59   : > { %p41_p10 = por %p40_p13, %p39_p8  ;;  %p2646_p5 = por %p2921_p3, %p39_p8 }
  0x5a   : > { %s269_s20 = sand.u32 1, %s2437_s26   ;;  %s1426_s21 = sshll.u32 %s2441_s27, 11 }
  0x5b   : > { %s1405_s16 = sshll.u32 %s269_s20, 7  ;;  %s2655_s10 = scalar_lea.hbm %s2903_s0, %s1426_s21 }
  0x5c   : > { %s273_s11 = scalar_lea.vmem [#allocation2], %s1405_s16  ;;  %p2657_p11 = pnand %p2081_p6, %p41_p10 }
  0x5d   : > { %s280_s14 = sshll.u32 %s273_s11, 4  ;;  %s2663_s12 = scalar_lea.sflag [#allocation3], %s269_s20  ;;  %s2661_s14 = int_to_ptr.vmem [resolvable:$true] %s280_s14 }
  0x5e   : > { %s2337_s17 = scalar_lea.hbm %s2655_s10, 2048  ;;  %p2339_p9 = pneg %p2657_p11 }
  0x5f   : > { %p2338_p7 = scmp.ne.s32.totalorder %s2655_s10, %s2337_s17  ;;  %s2342_s23 = scalar_lea.hbm %s2903_s0, 4096 }
  0x60   : > { %p2343_p1 = scmp.lt.u32.totalorder %s2655_s10, %s2903_s0  ;;  %p2344_p2 = scmp.lt.u32.totalorder %s2342_s23, %s2337_s17 }
  0x61   : > { %p2340_p12 = pnand %p2339_p9, %p2338_p7  ;;  %p2346_p8 = scmp.lt.u32.totalorder %s2337_s17, %s2655_s10 }
  0x62   : > { %p2345_p4 = por %p2344_p2, %p2343_p1 }
  0x63   : > { %p2341_p0 = pneg %p2340_p12 }
  0x64   : > { %p2347_p13 = por %p2346_p8, %p2345_p4 }
  0x66   : > { %p2348_p6 = pnand %p2347_p13, %p2341_p0 }
  0x68   : > { %2351 = shalt.err (!%p2348_p6)
}
  0x69   : > { %s2352_s20 = scalar_lea.vmem %s2661_s14, 2048  ;;  %s2448_s21 = smov [#allocation2]  }
  0x6a   : > { %p2353_p10 = scmp.ne.s32.totalorder %s2661_s14, %s2352_s20  ;;  %s2357_s16 = sshll.u32 %s2448_s21, 4  ;;  %s2358_s16 = int_to_ptr.vmem [resolvable:$false] %s2357_s16 }
  0x6b   : > { %s2359_s29 = scalar_lea.vmem %s2358_s16, 4096  ;;  %p2360_p12 = scmp.lt.s32.totalorder %s2661_s14, %s2358_s16 }
  0x6c   : > { %p2355_p3 = pnand %p2353_p10, %p2339_p9  ;;  %p2361_p1 = scmp.lt.s32.totalorder %s2359_s29, %s2352_s20 }
  0x6e   : > { %p2356_p7 = pneg %p2355_p3  ;;  %p2362_p2 = por %p2361_p1, %p2360_p12 }
  0x70   : > { %p2363_p4 = pnand %p2362_p2, %p2356_p7 }
  0x72   : > { %2366 = shalt.err (!%p2363_p4)
}
  0x73   : > { %2073 = dma.hbm_to_vmem [thread:$0]  (!%p2657_p11), %s2655_s10, 2048, %s2661_s14, %s2663_s12, %s2446_s13, %s2446_s13, %s2447_s15  }
  0x74   : > { %p2924_p9 = scmp.ne.s32.totalorder %s2918_s9, 0 }
  0x75   : > { %s2697_s17 = sand.u32 (!%p2924_p9), 1, %s2433_s25   ;;  %p2925_p0 = scmp.ne.s32.totalorder (!%p2924_p9), %s2915_s30, 0 }
  0x76   : > { %292 = sbr.rel (%p2924_p9) target bundleno = 1334 (0x536), region = 48  ;;  %s1409_s23 = sshll.u32 (!%p2924_p9), %s2697_s17, 7 }
  0x77   : > { %s295_s11 = scalar_lea.sflag (!%p2924_p9), [#allocation3], %s2697_s17  ;;  %s2703_s8 = scalar_lea.vmem (!%p2924_p9), [#allocation2], %s1409_s23 }
  0x7d   : > { %2412 = dma.done.wait (%p2925_p0), %s295_s11, 2048  }
  0x7e   : > { %2414 = vsyncadd (%p2925_p0), %s295_s11, 4294965248  ;;  %p2926_p11 = scmp.eq.s32.totalorder %s2513_s28, 0 }
  0x80   : > { %2416 = dma.done.wait (%p2926_p11), [#allocation6], 8192   ;;  %p2927_p8 = pmov %p2926_p11 }
  0x82   : > { %2418 = vsyncadd (%p2927_p8), [#allocation6], 4294959104  ;;  %p2928_p13 = pmov %p2927_p8 }
  0x83   : > { %p2929_p6 = pmov %p2927_p8 }
  0x84   : > { %2420 = dma.done.wait (%p2928_p13), [#allocation9], 2048  }
  0x85   : > { %2422 = vsyncadd (%p2929_p6), [#allocation9], 4294965248  ;;  %v359_v0 = vld [vmem:[#allocation5] sm:$0xff]  ;;  %v360_v1 = vld [vmem:[#allocation5 + $0x8] sm:$0xff]  ;;  %s2834_s29 = scalar_lea.vmem [#allocation10], %s1409_s23  ;;  %s1427_s23 = sshll.u32 %s2513_s28, 11 }
  0x86   : > { %v361_v2 = vld [vmem:[#allocation5 + $0x10] sm:$0xff]  ;;  %v1868_v3 = vpack.c.bf16 %v360_v1, %v359_v0  ;;  %v362_v4 = vld [vmem:[#allocation5 + $0x18] sm:$0xff]  ;;  %v363_v6 = vld [vmem:[#allocation5 + $0x20] sm:$0xff]  ;;  %s1297_s11 = sshll.u32 %s2834_s29, 4  ;;  %s2855_s9 = scalar_lea.hbm %s2910_s7, %s1427_s23  ;;  %s2857_s11 = int_to_ptr.vmem [resolvable:$true] %s1297_s11 }
  0x87   : > { %v1872_v5 = vpack.c.bf16 %v362_v4, %v361_v2  ;;  %v364_v7 = vld [vmem:[#allocation5 + $0x28] sm:$0xff]  ;;  %v343_v9 = vld [vmem:[%s2703_s8] sm:$0xff]  ;;  %v365_v10 = vld [vmem:[#allocation5 + $0x30] sm:$0xff]  ;;  %s1284_s28 = scalar_lea.sflag [#allocation4], %s2697_s17  ;;  %s2367_s13 = scalar_lea.vmem %s2857_s11, 2048 }
  0x88   : > { %1869 = vmatprep.subr.bf16.mxu0 %v1868_v3  ;;  %v1876_v8 = vpack.c.bf16 %v364_v7, %v363_v6  ;;  %v366_v11 = vld [vmem:[#allocation5 + $0x38] sm:$0xff]  ;;  %1620 = vmatprep.mubr.f32.mxu0 %v343_v9  ;;  %v367_v13 = vld [vmem:[#allocation5 + $0x40] sm:$0xff]  ;;  %v368_v14 = vld [vmem:[#allocation5 + $0x48] sm:$0xff]  ;;  %p2368_p10 = scmp.ne.s32.totalorder %s2857_s11, %s2367_s13  ;;  %s2449_s15 = smov [#allocation10]  }
  0x89   : > { %1871 = vmatpush3.bf16.msra.mxu0 %v1868_v3  ;;  %v1880_v12 = vpack.c.bf16 %v366_v11, %v365_v10  ;;  %v543_v15 = vld [vmem:[#allocation7] sm:$0xff]  ;;  %v544_v16 = vld [vmem:[#allocation7 + $0x8] sm:$0xff]  ;;  %v545_v17 = vld [vmem:[#allocation7 + $0x10] sm:$0xff]  ;;  %v1884_v21 = vpack.c.bf16 %v368_v14, %v367_v13  ;;  %s2371_s10 = sshll.u32 %s2449_s15, 4  ;;  %s2372_s10 = int_to_ptr.vmem [resolvable:$false] %s2371_s10 }
  0x8a   : > { %1873 = vmatprep.subr.bf16.mxu0 %v1872_v5  ;;  %v546_v18 = vld [vmem:[#allocation7 + $0x18] sm:$0xff]  ;;  %v1900_v19 = vpack.c.bf16 %v544_v16, %v543_v15  ;;  %v547_v22 = vld [vmem:[#allocation7 + $0x20] sm:$0xff]  ;;  %v548_v23 = vld [vmem:[#allocation7 + $0x28] sm:$0xff]  ;;  %p2369_p3 = pnand %p2368_p10, %p2646_p5  ;;  %s2373_s14 = scalar_lea.vmem %s2372_s10, 4096 }
  0x8b   : > { %v1904_v20 = vpack.c.bf16 %v546_v18, %v545_v17  ;;  %v369_v24 = vld [vmem:[#allocation5 + $0x50] sm:$0xff]  ;;  %v370_v25 = vld [vmem:[#allocation5 + $0x58] sm:$0xff]  ;;  %v1908_v26 = vpack.c.bf16 %v548_v23, %v547_v22  ;;  %v371_v30 = vld [vmem:[#allocation5 + $0x60] sm:$0xff]  ;;  %p2374_p12 = scmp.lt.s32.totalorder %s2857_s11, %s2372_s10  ;;  %p2375_p1 = scmp.lt.s32.totalorder %s2373_s14, %s2367_s13 }
  0x8c   : > { %1901 = vmatprep.subr.bf16.mxu1 %v1900_v19  ;;  %v1888_v27 = vpack.c.bf16 %v370_v25, %v369_v24  ;;  %v549_v28 = vld [vmem:[#allocation7 + $0x30] sm:$0xff]  ;;  %v550_v29 = vld [vmem:[#allocation7 + $0x38] sm:$0xff]  ;;  %v372_v31 = vld [vmem:[#allocation5 + $0x68] sm:$0xff]  ;;  %p2370_p7 = pneg %p2369_p3 }
  0x8d   : > { %1875 = vmatpush3.bf16.msra.mxu0 %v1872_v5  ;;  %1903 = vmatpush3.bf16.msra.mxu1 %v1900_v19  ;;  %v1912_v32 = vpack.c.bf16 %v550_v29, %v549_v28  ;;  %v1892_v33 = vpack.c.bf16 %v372_v31, %v371_v30  ;;  %v373_v34 = vld [vmem:[#allocation5 + $0x70] sm:$0xff]  ;;  %v374_v35 = vld [vmem:[#allocation5 + $0x78] sm:$0xff]  ;;  %v344_v37 = vld [vmem:[%s2703_s8 + $0x8] sm:$0xff]  ;;  %p2376_p2 = por %p2375_p1, %p2374_p12 }
  0x8e   : > { %1877 = vmatprep.subr.bf16.mxu0 %v1876_v8  ;;  %1905 = vmatprep.subr.bf16.mxu1 %v1904_v20  ;;  %v1896_v36 = vpack.c.bf16 %v374_v35, %v373_v34  ;;  %v345_v38 = vld [vmem:[%s2703_s8 + $0x10] sm:$0xff]  ;;  %v346_v39 = vld [vmem:[%s2703_s8 + $0x18] sm:$0xff]  ;;  %v347_v40 = vld [vmem:[%s2703_s8 + $0x20] sm:$0xff] }
  0x8f   : > { %v348_v41 = vld [vmem:[%s2703_s8 + $0x28] sm:$0xff]  ;;  %v349_v42 = vld [vmem:[%s2703_s8 + $0x30] sm:$0xff]  ;;  %v350_v43 = vld [vmem:[%s2703_s8 + $0x38] sm:$0xff]  ;;  %p2377_p4 = pnand %p2376_p2, %p2370_p7 }
  0x90   : > { %v351_v44 = vld [vmem:[%s2703_s8 + $0x40] sm:$0xff]  ;;  %v352_v45 = vld [vmem:[%s2703_s8 + $0x48] sm:$0xff]  ;;  %v353_v46 = vld [vmem:[%s2703_s8 + $0x50] sm:$0xff] }
  0x91   : > { %1879 = vmatpush3.bf16.msra.mxu0 %v1876_v8  ;;  %1907 = vmatpush3.bf16.msra.mxu1 %v1904_v20  ;;  %v354_v47 = vld [vmem:[%s2703_s8 + $0x58] sm:$0xff]  ;;  %v355_v48 = vld [vmem:[%s2703_s8 + $0x60] sm:$0xff]  ;;  %v356_v49 = vld [vmem:[%s2703_s8 + $0x68] sm:$0xff] }
  0x92   : > { %1881 = vmatprep.subr.bf16.mxu0 %v1880_v12  ;;  %1909 = vmatprep.subr.bf16.mxu1 %v1908_v26  ;;  %v357_v50 = vld [vmem:[%s2703_s8 + $0x70] sm:$0xff]  ;;  %v358_v51 = vld [vmem:[%s2703_s8 + $0x78] sm:$0xff]  ;;  %v551_v52 = vld [vmem:[#allocation7 + $0x40] sm:$0xff] }
  0x93   : > { %v552_v53 = vld [vmem:[#allocation7 + $0x48] sm:$0xff]  ;;  %v553_v55 = vld [vmem:[#allocation7 + $0x50] sm:$0xff]  ;;  %v554_v56 = vld [vmem:[#allocation7 + $0x58] sm:$0xff] }
  0x94   : > { %v1916_v54 = vpack.c.bf16 %v552_v53, %v551_v52  ;;  %v1920_v57 = vpack.c.bf16 %v554_v56, %v553_v55  ;;  %v555_v58 = vld [vmem:[#allocation7 + $0x60] sm:$0xff]  ;;  %v556_v59 = vld [vmem:[#allocation7 + $0x68] sm:$0xff]  ;;  %v557_v61 = vld [vmem:[#allocation7 + $0x70] sm:$0xff] }
  0x95   : > { %1883 = vmatpush3.bf16.msra.mxu0 %v1880_v12  ;;  %1911 = vmatpush3.bf16.msra.mxu1 %v1908_v26  ;;  %v1924_v60 = vpack.c.bf16 %v556_v59, %v555_v58  ;;  %v558_v62 = vld [vmem:[#allocation7 + $0x78] sm:$0xff]  ;;  %v728_v0 = vld [vmem:[#allocation7 + $0x80] sm:$0xff]  ;;  %v729_v1 = vld [vmem:[#allocation7 + $0x88] sm:$0xff] }
  0x96   : > { %1885 = vmatprep.subr.bf16.mxu0 %v1884_v21  ;;  %1913 = vmatprep.subr.bf16.mxu1 %v1912_v32  ;;  %v1928_v63 = vpack.c.bf16 %v558_v62, %v557_v61  ;;  %v730_v2 = vld [vmem:[#allocation7 + $0x90] sm:$0xff]  ;;  %v1932_v3 = vpack.c.bf16 %v729_v1, %v728_v0  ;;  %v731_v4 = vld [vmem:[#allocation7 + $0x98] sm:$0xff]  ;;  %v732_v6 = vld [vmem:[#allocation7 + $0xa0] sm:$0xff] }
  0x97   : > { %v1936_v5 = vpack.c.bf16 %v731_v4, %v730_v2  ;;  %v733_v7 = vld [vmem:[#allocation7 + $0xa8] sm:$0xff]  ;;  %v734_v9 = vld [vmem:[#allocation7 + $0xb0] sm:$0xff]  ;;  %v735_v10 = vld [vmem:[#allocation7 + $0xb8] sm:$0xff] }
  0x98   : > { %v1940_v8 = vpack.c.bf16 %v733_v7, %v732_v6  ;;  %v1944_v11 = vpack.c.bf16 %v735_v10, %v734_v9  ;;  %v736_v12 = vld [vmem:[#allocation7 + $0xc0] sm:$0xff]  ;;  %v737_v13 = vld [vmem:[#allocation7 + $0xc8] sm:$0xff]  ;;  %v738_v0 = vld [vmem:[#allocation7 + $0xd0] sm:$0xff] }
  0x99   : > { %1887 = vmatpush3.bf16.msra.mxu0 %v1884_v21  ;;  %1915 = vmatpush3.bf16.msra.mxu1 %v1912_v32  ;;  %v1948_v14 = vpack.c.bf16 %v737_v13, %v736_v12  ;;  %v2736_v15 = vld [vmem:[%s2905_s2] ss:$0 sm:$0xff]  ;;  %v739_v1 = vld [vmem:[#allocation7 + $0xd8] sm:$0xff]  ;;  %v741_v4 = vld [vmem:[#allocation7 + $0xe8] sm:$0xff] }
  0x9a   : > { %1889 = vmatprep.subr.bf16.mxu0 %v1888_v27  ;;  %1917 = vmatprep.subr.bf16.mxu1 %v1916_v54  ;;  %v1952_v2 = vpack.c.bf16 %v739_v1, %v738_v0  ;;  %v742_v6 = vld [vmem:[#allocation7 + $0xf0] sm:$0xff]  ;;  %v743_v7 = vld [vmem:[#allocation7 + $0xf8] sm:$0xff]  ;;  %v914_v9 = vld [vmem:[#allocation7 + $0x100] sm:$0xff] }
  0x9b   : > { %v915_v10 = vld [vmem:[#allocation7 + $0x108] sm:$0xff]  ;;  %v917_v13 = vld [vmem:[#allocation7 + $0x118] sm:$0xff] }
  0x9c   : > { %v1964_v12 = vpack.c.bf16 %v915_v10, %v914_v9  ;;  %v924_v9 = vld [vmem:[#allocation7 + $0x150] sm:$0xff]  ;;  %v925_v10 = vld [vmem:[#allocation7 + $0x158] sm:$0xff] }
  0x9d   : > { %1891 = vmatpush3.bf16.msra.mxu0 %v1888_v27  ;;  %1919 = vmatpush3.bf16.msra.mxu1 %v1916_v54 }
  0x9e   : > { %1893 = vmatprep.subr.bf16.mxu0 %v1892_v33  ;;  %1921 = vmatprep.subr.bf16.mxu1 %v1920_v57 }
  0xa1   : > { %1895 = vmatpush3.bf16.msra.mxu0 %v1892_v33  ;;  %1923 = vmatpush3.bf16.msra.mxu1 %v1920_v57 }
  0xa2   : > { %1897 = vmatprep.subr.bf16.mxu0 %v1896_v36  ;;  %1925 = vmatprep.subr.bf16.mxu1 %v1924_v60 }
  0xa5   : > { %1899 = vmatpush3.bf16.msra.mxu0 %v1896_v36  ;;  %1927 = vmatpush3.bf16.msra.mxu1 %v1924_v60 }
  0xa6   : > { %1929 = vmatprep.subr.bf16.mxu1 %v1928_v63  ;;  %1933 = vmatprep.subr.bf16.mxu0 %v1932_v3 }
  0xa8   : > { %1621 = vmatmul.mubr.f32.vlgmr.msra.gmra.mrb[0].mxu0 %v344_v37 }
  0xa9   : > { %1623 = vmatprep.mubr.f32.mxu0 %v345_v38  ;;  %1931 = vmatpush3.bf16.msra.mxu1 %v1928_v63 }
  0xaa   : > { %1935 = vmatpush3.bf16.msra.mxu0 %v1932_v3  ;;  %v740_v3 = vld [vmem:[#allocation7 + $0xe0] sm:$0xff]  ;;  %1965 = vmatprep.subr.bf16.mxu1 %v1964_v12 }
  0xab   : > { %1937 = vmatprep.subr.bf16.mxu0 %v1936_v5 }
  0xac   : > { %1624 = vmatmul.mubr.f32.gmra.mrb[2].mxu0 %v346_v39 }
  0xad   : > { %1626 = vmatprep.mubr.f32.mxu0 %v347_v40 }
  0xae   : > { %1939 = vmatpush3.bf16.msra.mxu0 %v1936_v5  ;;  %v1956_v5 = vpack.c.bf16 %v741_v4, %v740_v3 }
  0xaf   : > { %1941 = vmatprep.subr.bf16.mxu0 %v1940_v8 }
  0xb0   : > { %1627 = vmatmul.mubr.f32.gmra.mrb[4].mxu0 %v348_v41 }
  0xb1   : > { %1629 = vmatprep.mubr.f32.mxu0 %v349_v42 }
  0xb2   : > { %1943 = vmatpush3.bf16.msra.mxu0 %v1940_v8  ;;  %v1960_v8 = vpack.c.bf16 %v743_v7, %v742_v6 }
  0xb3   : > { %1945 = vmatprep.subr.bf16.mxu0 %v1944_v11 }
  0xb4   : > { %1630 = vmatmul.mubr.f32.gmra.mrb[6].mxu0 %v350_v43 }
  0xb5   : > { %1632 = vmatprep.mubr.f32.mxu0 %v351_v44 }
  0xb6   : > { %1947 = vmatpush3.bf16.msra.mxu0 %v1944_v11  ;;  %v916_v11 = vld [vmem:[#allocation7 + $0x110] sm:$0xff] }
  0xb7   : > { %1949 = vmatprep.subr.bf16.mxu0 %v1948_v14 }
  0xb8   : > { %1633 = vmatmul.mubr.f32.gmra.mrb[8].mxu0 %v352_v45 }
  0xb9   : > { %1635 = vmatprep.mubr.f32.mxu0 %v353_v46 }
  0xba   : > { %1951 = vmatpush3.bf16.msra.mxu0 %v1948_v14  ;;  %v1968_v14 = vpack.c.bf16 %v917_v13, %v916_v11  ;;  %v1984_v11 = vpack.c.bf16 %v925_v10, %v924_v9  ;;  %v927_v13 = vld [vmem:[#allocation7 + $0x168] sm:$0xff] }
  0xbb   : > { %1953 = vmatprep.subr.bf16.mxu0 %v1952_v2 }
  0xbc   : > { %1636 = vmatmul.mubr.f32.gmra.mrb[10].mxu0 %v354_v47 }
  0xbd   : > { %1638 = vmatprep.mubr.f32.mxu0 %v355_v48 }
  0xbe   : > { %1955 = vmatpush3.bf16.msra.mxu0 %v1952_v2 }
  0xbf   : > { %1957 = vmatprep.subr.bf16.mxu0 %v1956_v5 }
  0xc0   : > { %1639 = vmatmul.mubr.f32.gmra.mrb[12].mxu0 %v356_v49 }
  0xc1   : > { %1641 = vmatprep.mubr.f32.mxu0 %v357_v50 }
  0xc2   : > { %1959 = vmatpush3.bf16.msra.mxu0 %v1956_v5 }
  0xc3   : > { %1961 = vmatprep.subr.bf16.mxu0 %v1960_v8 }
  0xc4   : > { %1642 = vmatmul.mubr.f32.gmra.mrb[14].mxu0 %v358_v51 }
  0xc6   : > { %1963 = vmatpush3.bf16.msra.mxu0 %v1960_v8 }
 0x17b   : > { %v1622_v16 = vpop.f32.mrb[0].mxu0 }
 0x17c   : > { %v454_v17 = vadd.f32 %v1622_v16, %v2736_v15  ;;  %v448_v18 = vpop.f32.mrb[1].mxu0  ;;  %v919_v16 = vld [vmem:[#allocation7 + $0x128] sm:$0xff] }
 0x17d   : > { %v449_v19 = vadd.f32 %v2736_v15, %v448_v18  ;;  %v920_v18 = vld [vmem:[#allocation7 + $0x130] sm:$0xff] }
 0x17f   : > { %2125 = vtanh.f32 %v449_v19  ;;  %v1625_v20 = vpop.f32.mrb[2].mxu0  ;;  %v921_v19 = vld [vmem:[#allocation7 + $0x138] sm:$0xff] }
 0x180   : > { %2127 = vtanh.f32 %v454_v17  ;;  %v464_v21 = vadd.f32 %v1625_v20, %v2736_v15  ;;  %v458_v22 = vpop.f32.mrb[3].mxu0  ;;  %v1976_v20 = vpack.c.bf16 %v921_v19, %v920_v18  ;;  %v1099_v18 = vld [vmem:[#allocation8] sm:$0xff]  ;;  %v1100_v19 = vld [vmem:[#allocation8 + $0x8] sm:$0xff] }
 0x181   : > { %v459_v23 = vadd.f32 %v2736_v15, %v458_v22  ;;  %v923_v22 = vld [vmem:[#allocation7 + $0x148] sm:$0xff] }
 0x183   : > { %2129 = vtanh.f32 %v459_v23  ;;  %v1628_v24 = vpop.f32.mrb[4].mxu0 }
 0x184   : > { %2131 = vtanh.f32 %v464_v21  ;;  %v474_v25 = vadd.f32 %v1628_v24, %v2736_v15  ;;  %v468_v26 = vpop.f32.mrb[5].mxu0  ;;  %v922_v21 = vld [vmem:[#allocation7 + $0x140] sm:$0xff] }
 0x185   : > { %v469_v27 = vadd.f32 %v2736_v15, %v468_v26  ;;  %v1980_v23 = vpack.c.bf16 %v923_v22, %v922_v21  ;;  %v2757_v24 = vld [vmem:[%s2907_s4] ss:$0 sm:$0xff]  ;;  %v1996_v21 = vpack.c.bf16 %v1100_v19, %v1099_v18  ;;  %v1102_v22 = vld [vmem:[#allocation8 + $0x18] sm:$0xff]  ;;  %v1109_v18 = vld [vmem:[#allocation8 + $0x50] sm:$0xff] }
 0x186   : > { %v1110_v19 = vld [vmem:[#allocation8 + $0x58] sm:$0xff] }
 0x187   : > { %2133 = vtanh.f32 %v469_v27  ;;  %v1631_v28 = vpop.f32.mrb[6].mxu0  ;;  %1997 = vmatprep.subr.bf16.mxu0 %v1996_v21 }
 0x188   : > { %2135 = vtanh.f32 %v474_v25  ;;  %v484_v29 = vadd.f32 %v1631_v28, %v2736_v15  ;;  %v478_v30 = vpop.f32.mrb[7].mxu0 }
 0x189   : > { %v2126_v31 = vpop.eup %2125  ;;  %v479_v32 = vadd.f32 %v2736_v15, %v478_v30 }
 0x18a   : > { %v2128_v33 = vpop.eup %2127  ;;  %1676 = vmatprep.mubr.f32.mxu1 %v2126_v31 }
 0x18b   : > { %2137 = vtanh.f32 %v479_v32  ;;  %v1634_v34 = vpop.f32.mrb[8].mxu0  ;;  %1677 = vmatmul.mubr.f32.vlgmr.msra.gmra.mrb[0].mxu1 %v2128_v33 }
 0x18c   : > { %2139 = vtanh.f32 %v484_v29  ;;  %v494_v35 = vadd.f32 %v1634_v34, %v2736_v15  ;;  %v488_v36 = vpop.f32.mrb[9].mxu0  ;;  %1967 = vmatpush3.bf16.msra.mxu1 %v1964_v12  ;;  %v926_v12 = vld [vmem:[#allocation7 + $0x160] sm:$0xff] }
 0x18d   : > { %v2130_v37 = vpop.eup %2129  ;;  %v489_v38 = vadd.f32 %v2736_v15, %v488_v36  ;;  %1969 = vmatprep.subr.bf16.mxu1 %v1968_v14 }
 0x18e   : > { %v2132_v39 = vpop.eup %2131  ;;  %1679 = vmatprep.mubr.f32.mxu1 %v2130_v37 }
 0x18f   : > { %2141 = vtanh.f32 %v489_v38  ;;  %v1637_v40 = vpop.f32.mrb[10].mxu0  ;;  %1680 = vmatmul.mubr.f32.gmra.mrb[2].mxu1 %v2132_v39 }
 0x190   : > { %2143 = vtanh.f32 %v494_v35  ;;  %v504_v41 = vadd.f32 %v1637_v40, %v2736_v15  ;;  %v498_v42 = vpop.f32.mrb[11].mxu0  ;;  %1971 = vmatpush3.bf16.msra.mxu1 %v1968_v14  ;;  %v1988_v14 = vpack.c.bf16 %v927_v13, %v926_v12 }
 0x191   : > { %v2134_v43 = vpop.eup %2133  ;;  %v499_v44 = vadd.f32 %v2736_v15, %v498_v42 }
 0x192   : > { %v2136_v45 = vpop.eup %2135  ;;  %1682 = vmatprep.mubr.f32.mxu1 %v2134_v43 }
 0x193   : > { %2145 = vtanh.f32 %v499_v44  ;;  %v1640_v46 = vpop.f32.mrb[12].mxu0  ;;  %1683 = vmatmul.mubr.f32.gmra.mrb[4].mxu1 %v2136_v45 }
 0x194   : > { %2147 = vtanh.f32 %v504_v41  ;;  %v514_v47 = vadd.f32 %v1640_v46, %v2736_v15  ;;  %v508_v48 = vpop.f32.mrb[13].mxu0 }
 0x195   : > { %v2138_v49 = vpop.eup %2137  ;;  %v509_v50 = vadd.f32 %v2736_v15, %v508_v48 }
 0x196   : > { %v2140_v51 = vpop.eup %2139  ;;  %1685 = vmatprep.mubr.f32.mxu1 %v2138_v49 }
 0x197   : > { %2149 = vtanh.f32 %v509_v50  ;;  %v1643_v52 = vpop.f32.mrb[14].mxu0  ;;  %1686 = vmatmul.mubr.f32.gmra.mrb[6].mxu1 %v2140_v51 }
 0x198   : > { %2151 = vtanh.f32 %v514_v47  ;;  %v524_v53 = vadd.f32 %v1643_v52, %v2736_v15  ;;  %v518_v54 = vpop.f32.mrb[15].mxu0 }
 0x199   : > { %v2142_v55 = vpop.eup %2141  ;;  %v519_v56 = vadd.f32 %v2736_v15, %v518_v54  ;;  %v918_v15 = vld [vmem:[#allocation7 + $0x120] sm:$0xff] }
 0x19a   : > { %v2144_v57 = vpop.eup %2143  ;;  %1688 = vmatprep.mubr.f32.mxu1 %v2142_v55  ;;  %v1972_v17 = vpack.c.bf16 %v919_v16, %v918_v15  ;;  %v928_v15 = vld [vmem:[#allocation7 + $0x170] sm:$0xff]  ;;  %v929_v16 = vld [vmem:[#allocation7 + $0x178] sm:$0xff] }
 0x19b   : > { %2153 = vtanh.f32 %v519_v56  ;;  %1689 = vmatmul.mubr.f32.gmra.mrb[8].mxu1 %v2144_v57 }
 0x19c   : > { %2155 = vtanh.f32 %v524_v53  ;;  %1973 = vmatprep.subr.bf16.mxu1 %v1972_v17 }
 0x19d   : > { %v2146_v58 = vpop.eup %2145  ;;  %1975 = vmatpush3.bf16.msra.mxu1 %v1972_v17  ;;  %v1992_v17 = vpack.c.bf16 %v929_v16, %v928_v15  ;;  %v1107_v15 = vld [vmem:[#allocation8 + $0x40] sm:$0xff]  ;;  %v1108_v16 = vld [vmem:[#allocation8 + $0x48] sm:$0xff] }
 0x19e   : > { %v2148_v59 = vpop.eup %2147  ;;  %1691 = vmatprep.mubr.f32.mxu1 %v2146_v58  ;;  %1977 = vmatprep.subr.bf16.mxu1 %v1976_v20 }
 0x19f   : > { %1692 = vmatmul.mubr.f32.gmra.mrb[10].mxu1 %v2148_v59 }
 0x1a1   : > { %v2150_v60 = vpop.eup %2149  ;;  %1979 = vmatpush3.bf16.msra.mxu1 %v1976_v20  ;;  %v1101_v20 = vld [vmem:[#allocation8 + $0x10] sm:$0xff] }
 0x1a2   : > { %v2152_v61 = vpop.eup %2151  ;;  %1694 = vmatprep.mubr.f32.mxu1 %v2150_v60  ;;  %1981 = vmatprep.subr.bf16.mxu1 %v1980_v23 }
 0x1a3   : > { %1695 = vmatmul.mubr.f32.gmra.mrb[12].mxu1 %v2152_v61 }
 0x1a5   : > { %v2154_v62 = vpop.eup %2153  ;;  %1983 = vmatpush3.bf16.msra.mxu1 %v1980_v23  ;;  %v2000_v23 = vpack.c.bf16 %v1102_v22, %v1101_v20  ;;  %v2016_v20 = vpack.c.bf16 %v1110_v19, %v1109_v18  ;;  %v1112_v22 = vld [vmem:[#allocation8 + $0x68] sm:$0xff] }
 0x1a6   : > { %v2156_v63 = vpop.eup %2155  ;;  %1697 = vmatprep.mubr.f32.mxu1 %v2154_v62  ;;  %1985 = vmatprep.subr.bf16.mxu1 %v1984_v11 }
 0x1a7   : > { %1698 = vmatmul.mubr.f32.gmra.mrb[14].mxu1 %v2156_v63 }
 0x1a9   : > { %1987 = vmatpush3.bf16.msra.mxu1 %v1984_v11 }
 0x1aa   : > { %1989 = vmatprep.subr.bf16.mxu1 %v1988_v14 }
 0x1ad   : > { %1991 = vmatpush3.bf16.msra.mxu1 %v1988_v14 }
 0x1ae   : > { %1993 = vmatprep.subr.bf16.mxu1 %v1992_v17 }
 0x1b1   : > { %1995 = vmatpush3.bf16.msra.mxu1 %v1992_v17  ;;  %v2012_v17 = vpack.c.bf16 %v1108_v16, %v1107_v15 }
 0x1b2   : > { %2028 = vmatprep.subr.bf16.mxu1 %v1996_v21 }
 0x25e   : > { %v1678_v25 = vpop.f32.mrb[0].mxu1 }
 0x25f   : > { %v638_v26 = vadd.f32 %v1678_v25, %v2757_v24  ;;  %v632_v27 = vpop.f32.mrb[1].mxu1  ;;  %v1104_v25 = vld [vmem:[#allocation8 + $0x28] sm:$0xff] }
 0x260   : > { %v633_v28 = vadd.f32 %v2757_v24, %v632_v27  ;;  %v1105_v27 = vld [vmem:[#allocation8 + $0x30] sm:$0xff] }
 0x262   : > { %2157 = vtanh.f32 %v633_v28  ;;  %v1681_v29 = vpop.f32.mrb[2].mxu1  ;;  %v1106_v28 = vld [vmem:[#allocation8 + $0x38] sm:$0xff] }
 0x263   : > { %2159 = vtanh.f32 %v638_v26  ;;  %v648_v30 = vadd.f32 %v1681_v29, %v2757_v24  ;;  %v642_v31 = vpop.f32.mrb[3].mxu1  ;;  %v2778_v29 = vpack.c.bf16 %v1106_v28, %v1105_v27  ;;  %v2811_v27 = vld [vmem:[%s2907_s4 + $0x2] ss:$0 sm:$0xff] }
 0x264   : > { %v643_v32 = vadd.f32 %v2757_v24, %v642_v31 }
 0x266   : > { %2161 = vtanh.f32 %v643_v32  ;;  %v1684_v33 = vpop.f32.mrb[4].mxu1 }
 0x267   : > { %2163 = vtanh.f32 %v648_v30  ;;  %v658_v34 = vadd.f32 %v1684_v33, %v2757_v24  ;;  %v652_v35 = vpop.f32.mrb[5].mxu1  ;;  %v2786_v30 = vld [vmem:[%s2907_s4 + $0x1] ss:$0 sm:$0xff] }
 0x268   : > { %v653_v36 = vadd.f32 %v2757_v24, %v652_v35 }
 0x26a   : > { %2165 = vtanh.f32 %v653_v36  ;;  %v1687_v37 = vpop.f32.mrb[6].mxu1 }
 0x26b   : > { %2167 = vtanh.f32 %v658_v34  ;;  %v668_v38 = vadd.f32 %v1687_v37, %v2757_v24  ;;  %v662_v39 = vpop.f32.mrb[7].mxu1 }
 0x26c   : > { %v2158_v40 = vpop.eup %2157  ;;  %v663_v41 = vadd.f32 %v2757_v24, %v662_v39 }
 0x26d   : > { %v2160_v42 = vpop.eup %2159  ;;  %1732 = vmatprep.mubr.f32.mxu0 %v2158_v40 }
 0x26e   : > { %2169 = vtanh.f32 %v663_v41  ;;  %v1690_v43 = vpop.f32.mrb[8].mxu1  ;;  %1733 = vmatmul.mubr.f32.vlgmr.msra.gmra.mrb[16].mxu0 %v2160_v42 }
 0x26f   : > { %2171 = vtanh.f32 %v668_v38  ;;  %v678_v44 = vadd.f32 %v1690_v43, %v2757_v24  ;;  %v672_v45 = vpop.f32.mrb[9].mxu1  ;;  %1999 = vmatpush3.bf16.msra.mxu0 %v1996_v21 }
 0x270   : > { %v2162_v46 = vpop.eup %2161  ;;  %v673_v47 = vadd.f32 %v2757_v24, %v672_v45  ;;  %2001 = vmatprep.subr.bf16.mxu0 %v2000_v23 }
 0x271   : > { %v2164_v48 = vpop.eup %2163  ;;  %1735 = vmatprep.mubr.f32.mxu0 %v2162_v46 }
 0x272   : > { %2173 = vtanh.f32 %v673_v47  ;;  %v1693_v49 = vpop.f32.mrb[10].mxu1  ;;  %1736 = vmatmul.mubr.f32.gmra.mrb[18].mxu0 %v2164_v48 }
 0x273   : > { %2175 = vtanh.f32 %v678_v44  ;;  %v688_v50 = vadd.f32 %v1693_v49, %v2757_v24  ;;  %v682_v51 = vpop.f32.mrb[11].mxu1  ;;  %2003 = vmatpush3.bf16.msra.mxu0 %v2000_v23 }
 0x274   : > { %v2166_v52 = vpop.eup %2165  ;;  %v683_v53 = vadd.f32 %v2757_v24, %v682_v51 }
 0x275   : > { %v2168_v54 = vpop.eup %2167  ;;  %1738 = vmatprep.mubr.f32.mxu0 %v2166_v52 }
 0x276   : > { %2177 = vtanh.f32 %v683_v53  ;;  %v1696_v55 = vpop.f32.mrb[12].mxu1  ;;  %1739 = vmatmul.mubr.f32.gmra.mrb[20].mxu0 %v2168_v54 }
 0x277   : > { %2179 = vtanh.f32 %v688_v50  ;;  %v698_v56 = vadd.f32 %v1696_v55, %v2757_v24  ;;  %v692_v57 = vpop.f32.mrb[13].mxu1 }
 0x278   : > { %v2170_v58 = vpop.eup %2169  ;;  %v693_v59 = vadd.f32 %v2757_v24, %v692_v57 }
 0x279   : > { %v2172_v60 = vpop.eup %2171  ;;  %1741 = vmatprep.mubr.f32.mxu0 %v2170_v58 }
 0x27a   : > { %2181 = vtanh.f32 %v693_v59  ;;  %v1699_v61 = vpop.f32.mrb[14].mxu1  ;;  %1742 = vmatmul.mubr.f32.gmra.mrb[22].mxu0 %v2172_v60 }
 0x27b   : > { %2183 = vtanh.f32 %v698_v56  ;;  %v708_v62 = vadd.f32 %v1699_v61, %v2757_v24  ;;  %v702_v63 = vpop.f32.mrb[15].mxu1 }
 0x27c   : > { %v2174_v0 = vpop.eup %2173  ;;  %v703_v1 = vadd.f32 %v2757_v24, %v702_v63  ;;  %v1103_v24 = vld [vmem:[#allocation8 + $0x20] sm:$0xff] }
 0x27d   : > { %v2176_v2 = vpop.eup %2175  ;;  %1744 = vmatprep.mubr.f32.mxu0 %v2174_v0  ;;  %v2775_v26 = vpack.c.bf16 %v1104_v25, %v1103_v24  ;;  %v1113_v24 = vld [vmem:[#allocation8 + $0x70] sm:$0xff]  ;;  %v1114_v25 = vld [vmem:[#allocation8 + $0x78] sm:$0xff] }
 0x27e   : > { %2185 = vtanh.f32 %v703_v1  ;;  %1745 = vmatmul.mubr.f32.gmra.mrb[24].mxu0 %v2176_v2 }
 0x27f   : > { %2187 = vtanh.f32 %v708_v62  ;;  %2005 = vmatprep.subr.bf16.mxu0 %v2775_v26 }
 0x280   : > { %v2178_v3 = vpop.eup %2177  ;;  %2007 = vmatpush3.bf16.msra.mxu0 %v2775_v26 }
 0x281   : > { %v2180_v4 = vpop.eup %2179  ;;  %1747 = vmatprep.mubr.f32.mxu0 %v2178_v3  ;;  %2009 = vmatprep.subr.bf16.mxu0 %v2778_v29 }
 0x282   : > { %1748 = vmatmul.mubr.f32.gmra.mrb[26].mxu0 %v2180_v4 }
 0x284   : > { %v2182_v5 = vpop.eup %2181  ;;  %2011 = vmatpush3.bf16.msra.mxu0 %v2778_v29 }
 0x285   : > { %v2184_v6 = vpop.eup %2183  ;;  %1750 = vmatprep.mubr.f32.mxu0 %v2182_v5  ;;  %2013 = vmatprep.subr.bf16.mxu0 %v2012_v17 }
 0x286   : > { %1751 = vmatmul.mubr.f32.gmra.mrb[28].mxu0 %v2184_v6 }
 0x288   : > { %v2186_v7 = vpop.eup %2185  ;;  %2015 = vmatpush3.bf16.msra.mxu0 %v2012_v17 }
 0x289   : > { %v2188_v8 = vpop.eup %2187  ;;  %1753 = vmatprep.mubr.f32.mxu0 %v2186_v7  ;;  %2017 = vmatprep.subr.bf16.mxu0 %v2016_v20 }
 0x28a   : > { %1754 = vmatmul.mubr.f32.gmra.mrb[30].mxu0 %v2188_v8 }
 0x28c   : > { %2019 = vmatpush3.bf16.msra.mxu0 %v2016_v20 }
 0x341   : > { %v1734_v31 = vpop.f32.mrb[16].mxu0 }
 0x342   : > { %v824_v32 = vadd.f32 %v1734_v31, %v2786_v30  ;;  %v818_v33 = vpop.f32.mrb[17].mxu0 }
 0x343   : > { %v819_v34 = vadd.f32 %v2786_v30, %v818_v33 }
 0x345   : > { %2189 = vtanh.f32 %v819_v34  ;;  %v1737_v35 = vpop.f32.mrb[18].mxu0 }
 0x346   : > { %2191 = vtanh.f32 %v824_v32  ;;  %v834_v36 = vadd.f32 %v1737_v35, %v2786_v30  ;;  %v828_v37 = vpop.f32.mrb[19].mxu0 }
 0x347   : > { %v829_v38 = vadd.f32 %v2786_v30, %v828_v37 }
 0x349   : > { %2193 = vtanh.f32 %v829_v38  ;;  %v1740_v39 = vpop.f32.mrb[20].mxu0 }
 0x34a   : > { %2195 = vtanh.f32 %v834_v36  ;;  %v844_v40 = vadd.f32 %v1740_v39, %v2786_v30  ;;  %v838_v41 = vpop.f32.mrb[21].mxu0 }
 0x34b   : > { %v839_v42 = vadd.f32 %v2786_v30, %v838_v41 }
 0x34d   : > { %2197 = vtanh.f32 %v839_v42  ;;  %v1743_v43 = vpop.f32.mrb[22].mxu0 }
 0x34e   : > { %2199 = vtanh.f32 %v844_v40  ;;  %v854_v44 = vadd.f32 %v1743_v43, %v2786_v30  ;;  %v848_v45 = vpop.f32.mrb[23].mxu0 }
 0x34f   : > { %v2190_v46 = vpop.eup %2189  ;;  %v849_v47 = vadd.f32 %v2786_v30, %v848_v45 }
 0x350   : > { %v2192_v48 = vpop.eup %2191  ;;  %1788 = vmatprep.mubr.f32.mxu1 %v2190_v46 }
 0x351   : > { %2201 = vtanh.f32 %v849_v47  ;;  %v1746_v49 = vpop.f32.mrb[24].mxu0  ;;  %1789 = vmatmul.mubr.f32.vlgmr.msra.gmra.mrb[16].mxu1 %v2192_v48 }
 0x352   : > { %2203 = vtanh.f32 %v854_v44  ;;  %v864_v50 = vadd.f32 %v1746_v49, %v2786_v30  ;;  %v858_v51 = vpop.f32.mrb[25].mxu0  ;;  %2036 = vmatpush3.bf16.msra.mxu1 %v1996_v21  ;;  %v1111_v21 = vld [vmem:[#allocation8 + $0x60] sm:$0xff] }
 0x353   : > { %v2194_v52 = vpop.eup %2193  ;;  %v859_v53 = vadd.f32 %v2786_v30, %v858_v51  ;;  %2029 = vmatprep.subr.bf16.mxu1 %v2000_v23 }
 0x354   : > { %v2196_v54 = vpop.eup %2195  ;;  %1791 = vmatprep.mubr.f32.mxu1 %v2194_v52 }
 0x355   : > { %2205 = vtanh.f32 %v859_v53  ;;  %v1749_v55 = vpop.f32.mrb[26].mxu0  ;;  %1792 = vmatmul.mubr.f32.gmra.mrb[18].mxu1 %v2196_v54 }
 0x356   : > { %2207 = vtanh.f32 %v864_v50  ;;  %v874_v56 = vadd.f32 %v1749_v55, %v2786_v30  ;;  %v868_v57 = vpop.f32.mrb[27].mxu0  ;;  %2037 = vmatpush3.bf16.msra.mxu1 %v2000_v23  ;;  %v2020_v23 = vpack.c.bf16 %v1112_v22, %v1111_v21 }
 0x357   : > { %v2198_v58 = vpop.eup %2197  ;;  %v869_v59 = vadd.f32 %v2786_v30, %v868_v57  ;;  %2030 = vmatprep.subr.bf16.mxu1 %v2775_v26 }
 0x358   : > { %v2200_v60 = vpop.eup %2199  ;;  %1794 = vmatprep.mubr.f32.mxu1 %v2198_v58  ;;  %2021 = vmatprep.subr.bf16.mxu0 %v2020_v23 }
 0x359   : > { %2209 = vtanh.f32 %v869_v59  ;;  %v1752_v61 = vpop.f32.mrb[28].mxu0  ;;  %1795 = vmatmul.mubr.f32.gmra.mrb[20].mxu1 %v2200_v60  ;;  %2023 = vmatpush3.bf16.msra.mxu0 %v2020_v23 }
 0x35a   : > { %2211 = vtanh.f32 %v874_v56  ;;  %v884_v62 = vadd.f32 %v1752_v61, %v2786_v30  ;;  %v878_v63 = vpop.f32.mrb[29].mxu0  ;;  %2038 = vmatpush3.bf16.msra.mxu1 %v2775_v26  ;;  %v2024_v26 = vpack.c.bf16 %v1114_v25, %v1113_v24 }
 0x35b   : > { %v2202_v0 = vpop.eup %2201  ;;  %v879_v1 = vadd.f32 %v2786_v30, %v878_v63  ;;  %2031 = vmatprep.subr.bf16.mxu1 %v2778_v29 }
 0x35c   : > { %v2204_v2 = vpop.eup %2203  ;;  %1797 = vmatprep.mubr.f32.mxu1 %v2202_v0  ;;  %2025 = vmatprep.subr.bf16.mxu0 %v2024_v26 }
 0x35d   : > { %2213 = vtanh.f32 %v879_v1  ;;  %v1755_v3 = vpop.f32.mrb[30].mxu0  ;;  %1798 = vmatmul.mubr.f32.gmra.mrb[22].mxu1 %v2204_v2  ;;  %2027 = vmatpush3.bf16.msra.mxu0 %v2024_v26 }
 0x35e   : > { %2215 = vtanh.f32 %v884_v62  ;;  %v894_v4 = vadd.f32 %v1755_v3, %v2786_v30  ;;  %v888_v5 = vpop.f32.mrb[31].mxu0  ;;  %2039 = vmatpush3.bf16.msra.mxu1 %v2778_v29 }
 0x35f   : > { %v2206_v6 = vpop.eup %2205  ;;  %v889_v7 = vadd.f32 %v2786_v30, %v888_v5  ;;  %2032 = vmatprep.subr.bf16.mxu1 %v2012_v17 }
 0x360   : > { %v2208_v8 = vpop.eup %2207  ;;  %1800 = vmatprep.mubr.f32.mxu1 %v2206_v6 }
 0x361   : > { %2217 = vtanh.f32 %v889_v7  ;;  %1801 = vmatmul.mubr.f32.gmra.mrb[24].mxu1 %v2208_v8 }
 0x362   : > { %2219 = vtanh.f32 %v894_v4  ;;  %2040 = vmatpush3.bf16.msra.mxu1 %v2012_v17 }
 0x363   : > { %v2210_v9 = vpop.eup %2209  ;;  %2033 = vmatprep.subr.bf16.mxu1 %v2016_v20 }
 0x364   : > { %v2212_v10 = vpop.eup %2211  ;;  %1803 = vmatprep.mubr.f32.mxu1 %v2210_v9 }
 0x365   : > { %1804 = vmatmul.mubr.f32.gmra.mrb[26].mxu1 %v2212_v10 }
 0x366   : > { %2041 = vmatpush3.bf16.msra.mxu1 %v2016_v20 }
 0x367   : > { %v2214_v11 = vpop.eup %2213  ;;  %2034 = vmatprep.subr.bf16.mxu1 %v2020_v23 }
 0x368   : > { %v2216_v12 = vpop.eup %2215  ;;  %1806 = vmatprep.mubr.f32.mxu1 %v2214_v11 }
 0x369   : > { %1807 = vmatmul.mubr.f32.gmra.mrb[28].mxu1 %v2216_v12  ;;  %v1420_v12 = vld [vmem:[%s2909_s6] ss:$0 sm:$0xff] }
 0x36a   : > { %2042 = vmatpush3.bf16.msra.mxu1 %v2020_v23 }
 0x36b   : > { %v2218_v13 = vpop.eup %2217  ;;  %2035 = vmatprep.subr.bf16.mxu1 %v2024_v26 }
 0x36c   : > { %v2220_v14 = vpop.eup %2219  ;;  %1809 = vmatprep.mubr.f32.mxu1 %v2218_v13 }
 0x36d   : > { %1810 = vmatmul.mubr.f32.gmra.mrb[30].mxu1 %v2220_v14 }
 0x36e   : > { %2043 = vmatpush3.bf16.msra.mxu1 %v2024_v26 }
 0x424   : > { %v1790_v28 = vpop.f32.mrb[16].mxu1 }
 0x425   : > { %v1010_v29 = vadd.f32 %v1790_v28, %v2811_v27  ;;  %v1004_v30 = vpop.f32.mrb[17].mxu1 }
 0x426   : > { %v1005_v31 = vadd.f32 %v2811_v27, %v1004_v30 }
 0x428   : > { %2221 = vtanh.f32 %v1005_v31  ;;  %v1793_v32 = vpop.f32.mrb[18].mxu1 }
 0x429   : > { %2223 = vtanh.f32 %v1010_v29  ;;  %v1020_v33 = vadd.f32 %v1793_v32, %v2811_v27  ;;  %v1014_v34 = vpop.f32.mrb[19].mxu1 }
 0x42a   : > { %v1015_v35 = vadd.f32 %v2811_v27, %v1014_v34 }
 0x42c   : > { %2225 = vtanh.f32 %v1015_v35  ;;  %v1796_v36 = vpop.f32.mrb[20].mxu1 }
 0x42d   : > { %2227 = vtanh.f32 %v1020_v33  ;;  %v1030_v37 = vadd.f32 %v1796_v36, %v2811_v27  ;;  %v1024_v38 = vpop.f32.mrb[21].mxu1 }
 0x42e   : > { %v1025_v39 = vadd.f32 %v2811_v27, %v1024_v38 }
 0x430   : > { %2229 = vtanh.f32 %v1025_v39  ;;  %v1799_v40 = vpop.f32.mrb[22].mxu1 }
 0x431   : > { %2231 = vtanh.f32 %v1030_v37  ;;  %v1040_v41 = vadd.f32 %v1799_v40, %v2811_v27  ;;  %v1034_v42 = vpop.f32.mrb[23].mxu1 }
 0x432   : > { %v2222_v43 = vpop.eup %2221  ;;  %v1035_v44 = vadd.f32 %v2811_v27, %v1034_v42 }
 0x433   : > { %v2224_v45 = vpop.eup %2223  ;;  %1844 = vmatprep.mubr.f32.mxu0 %v2222_v43 }
 0x434   : > { %2233 = vtanh.f32 %v1035_v44  ;;  %v1802_v46 = vpop.f32.mrb[24].mxu1  ;;  %1845 = vmatmul.mubr.f32.vlgmr.msra.gmra.mrb[32].mxu0 %v2224_v45 }
 0x435   : > { %2235 = vtanh.f32 %v1040_v41  ;;  %v1050_v47 = vadd.f32 %v1802_v46, %v2811_v27  ;;  %v1044_v48 = vpop.f32.mrb[25].mxu1 }
 0x436   : > { %v2226_v49 = vpop.eup %2225  ;;  %v1045_v50 = vadd.f32 %v2811_v27, %v1044_v48 }
 0x437   : > { %v2228_v51 = vpop.eup %2227  ;;  %1847 = vmatprep.mubr.f32.mxu0 %v2226_v49 }
 0x438   : > { %2237 = vtanh.f32 %v1045_v50  ;;  %v1805_v52 = vpop.f32.mrb[26].mxu1  ;;  %1848 = vmatmul.mubr.f32.gmra.mrb[34].mxu0 %v2228_v51 }
 0x439   : > { %2239 = vtanh.f32 %v1050_v47  ;;  %v1060_v53 = vadd.f32 %v1805_v52, %v2811_v27  ;;  %v1054_v54 = vpop.f32.mrb[27].mxu1 }
 0x43a   : > { %v2230_v55 = vpop.eup %2229  ;;  %v1055_v56 = vadd.f32 %v2811_v27, %v1054_v54 }
 0x43b   : > { %v2232_v57 = vpop.eup %2231  ;;  %1850 = vmatprep.mubr.f32.mxu0 %v2230_v55 }
 0x43c   : > { %2241 = vtanh.f32 %v1055_v56  ;;  %v1808_v58 = vpop.f32.mrb[28].mxu1  ;;  %1851 = vmatmul.mubr.f32.gmra.mrb[36].mxu0 %v2232_v57 }
 0x43d   : > { %2243 = vtanh.f32 %v1060_v53  ;;  %v1070_v59 = vadd.f32 %v1808_v58, %v2811_v27  ;;  %v1064_v60 = vpop.f32.mrb[29].mxu1 }
 0x43e   : > { %v2234_v61 = vpop.eup %2233  ;;  %v1065_v62 = vadd.f32 %v2811_v27, %v1064_v60 }
 0x43f   : > { %v2236_v63 = vpop.eup %2235  ;;  %1853 = vmatprep.mubr.f32.mxu0 %v2234_v61 }
 0x440   : > { %2245 = vtanh.f32 %v1065_v62  ;;  %v1811_v0 = vpop.f32.mrb[30].mxu1  ;;  %1854 = vmatmul.mubr.f32.gmra.mrb[38].mxu0 %v2236_v63 }
 0x441   : > { %2247 = vtanh.f32 %v1070_v59  ;;  %v1080_v1 = vadd.f32 %v1811_v0, %v2811_v27  ;;  %v1074_v2 = vpop.f32.mrb[31].mxu1 }
 0x442   : > { %v2238_v3 = vpop.eup %2237  ;;  %v1075_v4 = vadd.f32 %v2811_v27, %v1074_v2 }
 0x443   : > { %v2240_v5 = vpop.eup %2239  ;;  %1856 = vmatprep.mubr.f32.mxu1 %v2238_v3 }
 0x444   : > { %2249 = vtanh.f32 %v1075_v4  ;;  %1857 = vmatmul.mubr.f32.vlgmr.msra.gmra.mrb[32].mxu1 %v2240_v5 }
 0x445   : > { %2251 = vtanh.f32 %v1080_v1 }
 0x446   : > { %v2242_v6 = vpop.eup %2241 }
 0x447   : > { %v2244_v7 = vpop.eup %2243  ;;  %1859 = vmatprep.mubr.f32.mxu1 %v2242_v6 }
 0x448   : > { %1860 = vmatmul.mubr.f32.gmra.mrb[34].mxu1 %v2244_v7 }
 0x44a   : > { %v2246_v8 = vpop.eup %2245 }
 0x44b   : > { %v2248_v9 = vpop.eup %2247  ;;  %1862 = vmatprep.mubr.f32.mxu1 %v2246_v8 }
 0x44c   : > { %1863 = vmatmul.mubr.f32.gmra.mrb[36].mxu1 %v2248_v9 }
 0x44e   : > { %v2250_v10 = vpop.eup %2249 }
 0x44f   : > { %v2252_v11 = vpop.eup %2251  ;;  %1865 = vmatprep.mubr.f32.mxu1 %v2250_v10 }
 0x450   : > { %1866 = vmatmul.mubr.f32.gmra.mrb[38].mxu1 %v2252_v11 }
 0x507   : > { %v1846_v13 = vpop.f32.mrb[32].mxu0 }
 0x508   : > { %v1194_v14 = vadd.f32 %v1846_v13, %v1420_v12  ;;  %v1188_v15 = vpop.f32.mrb[33].mxu0 }
 0x509   : > { %v1189_v16 = vadd.f32 %v1420_v12, %v1188_v15 }
 0x50a   : > { %1268 = vst [vmem:[%s2834_s29 + $0x8] sm:$0xff] %v1194_v14 }
 0x50b   : > { %1267 = vst [vmem:[%s2834_s29] sm:$0xff] %v1189_v16  ;;  %v1849_v17 = vpop.f32.mrb[34].mxu0 }
 0x50c   : > { %v1204_v18 = vadd.f32 %v1849_v17, %v1420_v12  ;;  %v1198_v19 = vpop.f32.mrb[35].mxu0 }
 0x50d   : > { %v1199_v20 = vadd.f32 %v1420_v12, %v1198_v19 }
 0x50e   : > { %1270 = vst [vmem:[%s2834_s29 + $0x18] sm:$0xff] %v1204_v18 }
 0x50f   : > { %1269 = vst [vmem:[%s2834_s29 + $0x10] sm:$0xff] %v1199_v20  ;;  %v1852_v21 = vpop.f32.mrb[36].mxu0 }
 0x510   : > { %v1214_v22 = vadd.f32 %v1852_v21, %v1420_v12  ;;  %v1208_v23 = vpop.f32.mrb[37].mxu0 }
 0x511   : > { %v1209_v24 = vadd.f32 %v1420_v12, %v1208_v23 }
 0x512   : > { %1272 = vst [vmem:[%s2834_s29 + $0x28] sm:$0xff] %v1214_v22 }
 0x513   : > { %1271 = vst [vmem:[%s2834_s29 + $0x20] sm:$0xff] %v1209_v24  ;;  %v1855_v25 = vpop.f32.mrb[38].mxu0 }
 0x514   : > { %v1224_v26 = vadd.f32 %v1855_v25, %v1420_v12  ;;  %v1218_v27 = vpop.f32.mrb[39].mxu0 }
 0x515   : > { %v1219_v28 = vadd.f32 %v1420_v12, %v1218_v27 }
 0x516   : > { %1274 = vst [vmem:[%s2834_s29 + $0x38] sm:$0xff] %v1224_v26 }
 0x517   : > { %1273 = vst [vmem:[%s2834_s29 + $0x30] sm:$0xff] %v1219_v28  ;;  %v1858_v29 = vpop.f32.mrb[32].mxu1 }
 0x518   : > { %v1234_v30 = vadd.f32 %v1858_v29, %v1420_v12  ;;  %v1228_v31 = vpop.f32.mrb[33].mxu1 }
 0x519   : > { %v1229_v32 = vadd.f32 %v1420_v12, %v1228_v31 }
 0x51a   : > { %1276 = vst [vmem:[%s2834_s29 + $0x48] sm:$0xff] %v1234_v30 }
 0x51b   : > { %1275 = vst [vmem:[%s2834_s29 + $0x40] sm:$0xff] %v1229_v32  ;;  %v1861_v33 = vpop.f32.mrb[34].mxu1 }
 0x51c   : > { %v1244_v34 = vadd.f32 %v1861_v33, %v1420_v12  ;;  %v1238_v35 = vpop.f32.mrb[35].mxu1 }
 0x51d   : > { %v1239_v36 = vadd.f32 %v1420_v12, %v1238_v35 }
 0x51e   : > { %1278 = vst [vmem:[%s2834_s29 + $0x58] sm:$0xff] %v1244_v34 }
 0x51f   : > { %1277 = vst [vmem:[%s2834_s29 + $0x50] sm:$0xff] %v1239_v36  ;;  %v1864_v37 = vpop.f32.mrb[36].mxu1 }
 0x520   : > { %v1254_v38 = vadd.f32 %v1864_v37, %v1420_v12  ;;  %v1248_v39 = vpop.f32.mrb[37].mxu1 }
 0x521   : > { %v1249_v40 = vadd.f32 %v1420_v12, %v1248_v39 }
 0x522   : > { %1280 = vst [vmem:[%s2834_s29 + $0x68] sm:$0xff] %v1254_v38 }
 0x523   : > { %1279 = vst [vmem:[%s2834_s29 + $0x60] sm:$0xff] %v1249_v40  ;;  %v1867_v41 = vpop.f32.mrb[38].mxu1 }
 0x524   : > { %v1264_v42 = vadd.f32 %v1867_v41, %v1420_v12  ;;  %v1258_v43 = vpop.f32.mrb[39].mxu1 }
 0x525   : > { %v1259_v44 = vadd.f32 %v1420_v12, %v1258_v43 }
 0x526   : > { %1282 = vst [vmem:[%s2834_s29 + $0x78] sm:$0xff] %v1264_v42 }
 0x527   : > { %1281 = vst [vmem:[%s2834_s29 + $0x70] sm:$0xff] %v1259_v44 }
 0x528   : > { %2380 = shalt.err (!%p2377_p4)
}
 0x529   : > { %s2381_s12 = scalar_lea.hbm %s2855_s9, 2048  ;;  %s2385_s16 = scalar_lea.hbm %s2910_s7, 4096 }
 0x52a   : > { %p2382_p9 = scmp.ne.s32.totalorder %s2855_s9, %s2381_s12  ;;  %p2386_p8 = scmp.lt.u32.totalorder %s2855_s9, %s2910_s7 }
 0x52b   : > { %p2387_p13 = scmp.lt.u32.totalorder %s2385_s16, %s2381_s12  ;;  %p2389_p10 = scmp.lt.u32.totalorder %s2381_s12, %s2855_s9 }
 0x52c   : > { %p2383_p0 = pnand %p2382_p9, %p2646_p5 }
 0x52d   : > { %p2388_p6 = por %p2387_p13, %p2386_p8 }
 0x52e   : > { %p2384_p11 = pneg %p2383_p0 }
 0x52f   : > { %p2390_p3 = por %p2389_p10, %p2388_p6 }
 0x531   : > { %p2391_p7 = pnand %p2390_p3, %p2384_p11 }
 0x533   : > { %2394 = shalt.err (!%p2391_p7)
}
 0x534   : > { %s2450_s8 = smov 128   ;;  %s2451_s30 = smov 8  }
 0x535   : > { %2058 = dma.vmem_to_hbm [thread:$0]  (%p2646_p5), %s2857_s11, 2048, %s2855_s9, %s1284_s28, %s2450_s8, %s2450_s8, %s2451_s30  }
 0x536 PF: > { %s2930_s13 = sld [smem:[#allocation15_spill]]  ;;  %s1312_s15 = sand.u32 1, %s2429_s24  }
 0x537   : > { %p2932_p1 = scmp.ge.s32.totalorder %s2441_s27, 2  ;;  %s1313_s10 = scalar_lea.sflag [#allocation4], %s1312_s15 }
 0x53c   : > { %p2931_p12 = scmp.ne.s32.totalorder %s2930_s13, 0 }
 0x53e   : > { %p2075_p2 = pnand %p2932_p1, %p2931_p12 }
 0x540   : > { %2424 = dma.done.wait (!%p2075_p2), %s1313_s10, 2048  }
 0x541   : > { %2426 = vsyncadd (!%p2075_p2), %s1313_s10, 4294965248  ;;  %p22_p4 = scmp.ge.s32.totalorder %s2632_s22, 4   ;;  %s2933_s24 = smov %s2433_s25 }
 0x542   : > { %s2934_s25 = smov %s2437_s26  ;;  %s2935_s26 = smov %s2642_s18 }
 0x543   : > { %s2936_s27 = smov %s2632_s22  ;;  %24 = sbr.rel (!%p22_p4) target bundleno = 7 (0x7), region = 109 }
 0x54a   :  { %1318 = vsyncpa [#allocation3], 1 }
 0x54b   :  { %1320 = vsyncpa [#allocation3 + $0x1], 1 }
 0x54c   :  { %1321 = vsyncpa [#allocation6], 1 }
 0x54d   :  { %1322 = vsyncpa [#allocation9], 1 }
 0x54e   :  { %1323 = vsyncpa [#allocation4], 1 }
 0x54f   :  { %1325 = vsyncpa [#allocation4 + $0x1], 1 }

</bundles_post_ra>
